<compile_context>
chip_gen: v7x
topology: tpu7x:2x2x1
jax: 0.10.0
libtpu: 0.0.40
codegen_flags: <defaults>
</compile_context>

<pallas_src>
import functools

import jax
import jax.numpy as jnp
from jax import lax
from jax.experimental import pallas as pl
from jax.experimental.pallas import tpu as pltpu

_PAD_L = 128  # lane-aligned zero border around the flattened image in VMEM


def _basic_block_kernel(x_ref, w1_ref, b1_ref, w2_ref, b2_ref, mask_ref,
                        o_ref, slab_ref, col_ref, *, img_w, img_hw):
    # x_ref    : (BB, C, HWp)        input batch block (f32)
    # w1_ref   : (Cout, 9*C)         conv1 weights, BN1 scale folded (matmul dtype)
    # b1_ref   : (C, 1)              BN1 shift (f32)
    # w2_ref   : (Cout, 9*Cout)      conv2 weights, BN2 scale folded
    # b2_ref   : (C, 1)              BN2 shift
    # mask_ref : (6, 1, HWp)         validity masks for the 6 dx != 0 taps (f32)
    # o_ref    : (BB, C, HWp)
    # slab_ref : VMEM (C, HWp + 2*_PAD_L) f32  zero-bordered image slab
    # col_ref  : VMEM (9*C, HWp)     im2col scratch (matmul dtype)
    bb, c, hw_pad = x_ref.shape

    # Zero the two lane-aligned borders once per grid step; the interior is
    # fully rewritten for every batch element below.
    border = jnp.zeros((c, _PAD_L), jnp.float32)
    slab_ref[:, :_PAD_L] = border
    slab_ref[:, _PAD_L + hw_pad:_PAD_L + hw_pad + _PAD_L] = border

    # Hoist the 6 mask loads (dx != 0 taps only).
    masks = [mask_ref[i] for i in range(6)]

    # When HW was padded up to a lane multiple, keep the padded lanes of the
    # slab at zero so the unmasked (dx == 0) taps stay correct.
    if hw_pad != img_hw:
        lane_valid = (lax.broadcasted_iota(jnp.int32, (1, hw_pad), 1)
                      < img_hw).astype(jnp.float32)
    else:
        lane_valid = None

    def build_im2col():
        # Row block t = ky*3+kx of col_ref holds the (masked) shifted tap, so
        # each 3x3 conv becomes a single (Cout, 9C) @ (9C, HWp) MXU matmul.
        mi = 0
        for ky in range(3):
            for kx in range(3):
                t = ky * 3 + kx
                s = (ky - 1) * img_w + (kx - 1)
                # TODO(synk): these lane-unaligned static slices may lower to
                # lane-shift copies on the ld/st slots; if a bundle dump shows
                # that, move the shift onto the XLU via pltpu.roll instead.
                tap = slab_ref[:, _PAD_L + s:_PAD_L + s + hw_pad]
                if kx != 1:                       # dx == 0 needs no mask
                    tap = tap * masks[mi]
                    mi += 1
                col_ref[t * c:(t + 1) * c, :] = tap.astype(col_ref.dtype)

    def body(b, carry):
        # conv1 (BN1 scale folded into weights) -> +shift -> ReLU
        slab_ref[:, _PAD_L:_PAD_L + hw_pad] = x_ref[b].astype(jnp.float32)
        build_im2col()
        y = jnp.dot(w1_ref[...], col_ref[...],
                    preferred_element_type=jnp.float32)
        y = jnp.maximum(y + b1_ref[...], 0.0)
        if lane_valid is not None:
            y = y * lane_valid                    # zero the padded lanes

        # conv2 (BN2 scale folded) -> +shift -> +residual -> ReLU
        slab_ref[:, _PAD_L:_PAD_L + hw_pad] = y
        build_im2col()
        y = jnp.dot(w2_ref[...], col_ref[...],
                    preferred_element_type=jnp.float32)
        y = y + b2_ref[...] + x_ref[b].astype(jnp.float32)
        o_ref[b] = jnp.maximum(y, 0.0).astype(o_ref.dtype)
        return carry

    lax.fori_loop(0, bb, body, 0, unroll=True)


def _tpu_generation():
    """Generation-aware tiling / VMEM policy."""
    try:
        kind = jax.devices()[0].device_kind.lower()
    except Exception:
        kind = ""
    if "v7" in kind:
        # 2 TensorCores, 64 MiB VMEM: keep >= 2 parallel grid steps, tight VMEM.
        return {"num_tc": 2, "vmem_ceiling": 48 << 20, "target_tile": 6 << 20}
    if "v6" in kind or "v5e" in kind or "v5 lite" in kind or "lite" in kind:
        # 1 TensorCore, 128 MiB VMEM: no forced grid split, big tiles.
        return {"num_tc": 1, "vmem_ceiling": 100 << 20, "target_tile": 16 << 20}
    if "v4" in kind or "v5" in kind:
        # v4 / v5p megacore: 2 TCs, 128 MiB VMEM.
        return {"num_tc": 2, "vmem_ceiling": 100 << 20, "target_tile": 16 << 20}
    # Unknown device: conservative defaults.
    return {"num_tc": 2, "vmem_ceiling": 48 << 20, "target_tile": 6 << 20}


def _pick_batch_block(batch, bytes_per_batch, target_bytes, num_tc):
    """Largest divisor of `batch` under the tile target; keep >= num_tc steps."""
    max_bb = max(1, target_bytes // max(bytes_per_batch, 1))
    if num_tc > 1 and batch >= num_tc:
        max_bb = min(max_bb, batch // num_tc)
    bb = 1
    for d in range(1, batch + 1):
        if batch % d == 0 and d <= max_bb:
            bb = d
    return bb


def basic_block(x, w1, gamma1, beta1, mean1, var1,
                w2, gamma2, beta2, mean2, var2, *,
                eps=1e-5, matmul_dtype=jnp.bfloat16):
    """BasicBlock forward (stride=1, downsample=None), BN in inference mode."""
    B, C, H, W = x.shape
    Cout = w1.shape[0]
    assert w1.shape == (Cout, C, 3, 3) and w2.shape == (Cout, Cout, 3, 3)
    assert Cout == C, "downsample=None requires inplanes == planes"
    assert W + 1 <= _PAD_L, "image width too large for the fixed lane border"

    f32 = jnp.float32
    HW = H * W
    HW_pad = ((HW + 127) // 128) * 128          # lane-dense output stores

    # Fold inference-mode BN into the convs: scale into the weights, shift
    # stays as a tiny per-channel kernel input.
    inv1 = gamma1.astype(f32) / jnp.sqrt(var1.astype(f32) + eps)
    inv2 = gamma2.astype(f32) / jnp.sqrt(var2.astype(f32) + eps)
    b1 = (beta1.astype(f32) - mean1.astype(f32) * inv1).reshape(C, 1)
    b2 = (beta2.astype(f32) - mean2.astype(f32) * inv2).reshape(C, 1)

    # Weights as one (Cout, 9*Cin) matrix; column index = (ky*3+kx)*Cin + cin,
    # matching the im2col row order built in the kernel.
    w1_m = jnp.transpose(w1.astype(f32), (0, 2, 3, 1)).reshape(Cout, 9 * C)
    w2_m = jnp.transpose(w2.astype(f32), (0, 2, 3, 1)).reshape(Cout, 9 * Cout)
    w1_m = (w1_m * inv1[:, None]).astype(matmul_dtype)
    w2_m = (w2_m * inv2[:, None]).astype(matmul_dtype)

    # Validity masks only for the 6 dx != 0 taps (x-wrap + image border);
    # masks are zero on the padded lanes as well.
    yy, xx = jnp.meshgrid(jnp.arange(H), jnp.arange(W), indexing="ij")
    masks = []
    for ky in range(3):
        for kx in (0, 2):
            dy, dx = ky - 1, kx - 1
            valid = ((yy + dy >= 0) & (yy + dy < H)
                     & (xx + dx >= 0) & (xx + dx < W)).reshape(HW)
            valid = jnp.pad(valid, (0, HW_pad - HW))
            masks.append(valid.reshape(1, HW_pad))
    masks = jnp.stack(masks).astype(f32)                          # (6, 1, HWp)

    x_flat = x.reshape(B, C, HW)
    if HW_pad != HW:
        x_flat = jnp.pad(x_flat, ((0, 0), (0, 0), (0, HW_pad - HW)))

    gen = _tpu_generation()
    io_bytes_per_batch = 2 * C * HW_pad * x.dtype.itemsize        # in + out tile
    bb = _pick_batch_block(B, io_bytes_per_batch, gen["target_tile"],
                           gen["num_tc"])
    grid = (B // bb,)

    # VMEM residency: 2x pipelined x/out tiles, <= 2x grid-invariant params,
    # 1x scratch, plus slack; clamp to a per-generation ceiling.
    mm_itemsize = jax.dtypes.canonicalize_dtype(matmul_dtype).itemsize
    tile_bytes = bb * io_bytes_per_batch
    param_bytes = ((w1_m.size + w2_m.size) * mm_itemsize
                   + (masks.size + b1.size + b2.size) * 4)
    scratch_bytes = (C * (HW_pad + 2 * _PAD_L) * 4
                     + 9 * C * HW_pad * mm_itemsize)
    vmem_limit = int(min(max(2 * tile_bytes + 2 * param_bytes + scratch_bytes
                             + (2 << 20), 8 << 20), gen["vmem_ceiling"]))

    kernel = functools.partial(_basic_block_kernel, img_w=W, img_hw=HW)

    out_flat = pl.pallas_call(
        kernel,
        out_shape=jax.ShapeDtypeStruct((B, C, HW_pad), x.dtype),
        grid_spec=pltpu.PrefetchScalarGridSpec(
            num_scalar_prefetch=0,
            grid=grid,
            in_specs=[
                pl.BlockSpec((bb, C, HW_pad), lambda i: (i, 0, 0)),
                pl.BlockSpec((Cout, 9 * C), lambda i: (0, 0)),
                pl.BlockSpec((C, 1), lambda i: (0, 0)),
                pl.BlockSpec((Cout, 9 * Cout), lambda i: (0, 0)),
                pl.BlockSpec((C, 1), lambda i: (0, 0)),
                pl.BlockSpec((6, 1, HW_pad), lambda i: (0, 0, 0)),
            ],
            out_specs=pl.BlockSpec((bb, C, HW_pad), lambda i: (i, 0, 0)),
            scratch_shapes=[
                pltpu.VMEM((C, HW_pad + 2 * _PAD_L), jnp.float32),
                pltpu.VMEM((9 * C, HW_pad), matmul_dtype),
            ],
        ),
        compiler_params=pltpu.CompilerParams(
            dimension_semantics=("parallel",),
            vmem_limit_bytes=vmem_limit,
        ),
        cost_estimate=pl.CostEstimate(
            flops=2 * 2 * 9 * B * C * Cout * HW_pad,
            transcendentals=0,
            bytes_accessed=2 * B * C * HW_pad * x.dtype.itemsize + param_bytes,
        ),
    )(x_flat, w1_m, b1, w2_m, b2, masks)

    return out_flat[:, :, :HW].reshape(B, C, H, W)


def basic_block_ref(x, w1, g1, be1, m1, v1, w2, g2, be2, m2, v2, eps=1e-5):
    """Pure-JAX reference mirroring the PyTorch forward (BN in eval mode)."""
    def conv(inp, w):
        return lax.conv_general_dilated(
            inp, w, window_strides=(1, 1), padding=((1, 1), (1, 1)),
            dimension_numbers=("NCHW", "OIHW", "NCHW"),
            precision=lax.Precision.HIGHEST)

    def bn(inp, g, b, m, v):
        g, b, m, v = (a[None, :, None, None] for a in (g, b, m, v))
        return (inp - m) * (g / jnp.sqrt(v + eps)) + b

    out = jnp.maximum(bn(conv(x, w1), g1, be1, m1, v1), 0.0)
    out = bn(conv(out, w2), g2, be2, m2, v2)
    return jnp.maximum(out + x, 0.0)


if __name__ == "__main__":
    # BasicBlock(inplanes=8, planes=8), stride=1, downsample=None; batch=2, 16x16.
    B, C, H, W = 2, 8, 16, 16
    key = jax.random.PRNGKey(0)
    ks = jax.random.split(key, 12)
    x = jax.random.normal(ks[0], (B, C, H, W), jnp.float32)
    wstd = (2.0 / (9 * C)) ** 0.5
    w1 = jax.random.normal(ks[1], (C, C, 3, 3), jnp.float32) * wstd
    w2 = jax.random.normal(ks[2], (C, C, 3, 3), jnp.float32) * wstd
    gamma1 = 1.0 + 0.1 * jax.random.normal(ks[3], (C,), jnp.float32)
    beta1 = 0.1 * jax.random.normal(ks[4], (C,), jnp.float32)
    mean1 = 0.1 * jax.random.normal(ks[5], (C,), jnp.float32)
    var1 = 1.0 + 0.1 * jnp.abs(jax.random.normal(ks[6], (C,), jnp.float32))
    gamma2 = 1.0 + 0.1 * jax.random.normal(ks[7], (C,), jnp.float32)
    beta2 = 0.1 * jax.random.normal(ks[8], (C,), jnp.float32)
    mean2 = 0.1 * jax.random.normal(ks[9], (C,), jnp.float32)
    var2 = 1.0 + 0.1 * jnp.abs(jax.random.normal(ks[10], (C,), jnp.float32))

    args = (x, w1, gamma1, beta1, mean1, var1, w2, gamma2, beta2, mean2, var2)
    ref = basic_block_ref(*args)

    # Exact-structure check: f32 matmul operands vs pure-JAX reference.
    out_f32 = jax.block_until_ready(basic_block(*args, matmul_dtype=jnp.float32))
    assert out_f32.shape == (B, C, H, W)
    assert jnp.allclose(out_f32, ref, atol=1e-3, rtol=1e-3), "f32 path mismatch"

    # Fast path (default): bf16 matmul operands, f32 accumulation.
    out_bf16 = jax.block_until_ready(basic_block(*args))
    assert out_bf16.shape == (B, C, H, W)
    assert jnp.allclose(out_bf16, ref, atol=5e-2, rtol=5e-2), "bf16 path mismatch"

    print("KERNEL_OK")
</pallas_src>

<mosaic_0001>
module attributes {stable_mosaic.version = 11 : i64} {
  func.func @_basic_block_kernel(%arg0: i32, %arg1: memref<1x8x256xf32, #tpu.memory_space<vmem>>, %arg2: memref<8x72xf32, #tpu.memory_space<vmem>>, %arg3: memref<8x1xf32, #tpu.memory_space<vmem>>, %arg4: memref<8x72xf32, #tpu.memory_space<vmem>>, %arg5: memref<8x1xf32, #tpu.memory_space<vmem>>, %arg6: memref<6x1x256xf32, #tpu.memory_space<vmem>>, %arg7: memref<1x8x256xf32, #tpu.memory_space<vmem>>, %arg8: memref<8x512xf32, #tpu.memory_space<vmem>>, %arg9: memref<72x256xf32, #tpu.memory_space<vmem>>) attributes {dimension_semantics = [#tpu.dimension_semantics<parallel>], iteration_bounds = array<i64: 2>, scalar_prefetch = 0 : i64, scratch_operands = 2 : i64, tpu.core_type = #tpu.core_type<tc>, window_params = [{transform_indices = @transform_0, window_bounds = array<i64: 1, 8, 256>}, {pipeline_mode = #tpu.pipeline_mode<synchronous>, transform_indices = @transform_1, window_bounds = array<i64: 8, 72>}, {pipeline_mode = #tpu.pipeline_mode<synchronous>, transform_indices = @transform_2, window_bounds = array<i64: 8, 1>}, {pipeline_mode = #tpu.pipeline_mode<synchronous>, transform_indices = @transform_3, window_bounds = array<i64: 8, 72>}, {pipeline_mode = #tpu.pipeline_mode<synchronous>, transform_indices = @transform_4, window_bounds = array<i64: 8, 1>}, {pipeline_mode = #tpu.pipeline_mode<synchronous>, transform_indices = @transform_5, window_bounds = array<i64: 6, 1, 256>}, {transform_indices = @transform_6, window_bounds = array<i64: 1, 8, 256>}]} {
    %cst = arith.constant 0.000000e+00 : f32
    %0 = vector.broadcast %cst : f32 to vector<8x128xf32>
    %c0 = arith.constant 0 : index
    %c0_0 = arith.constant 0 : index
    %1 = vector.load %arg8[%c0, %c0_0] : memref<8x512xf32, #tpu.memory_space<vmem>>, vector<8x128xf32>
    tpu.vector_store %arg8[%c0, %c0_0], %0 {strides = array<i32>} : memref<8x512xf32, #tpu.memory_space<vmem>>, vector<8x128xf32>,
    %c0_1 = arith.constant 0 : index
    %c384 = arith.constant 384 : index
    %2 = vector.load %arg8[%c0_1, %c384] : memref<8x512xf32, #tpu.memory_space<vmem>>, vector<8x128xf32>
    tpu.vector_store %arg8[%c0_1, %c384], %0 {strides = array<i32>} : memref<8x512xf32, #tpu.memory_space<vmem>>, vector<8x128xf32>,
    %c0_2 = arith.constant 0 : index
    %c0_3 = arith.constant 0 : index
    %c0_4 = arith.constant 0 : index
    %3 = vector.load %arg6[%c0_2, %c0_3, %c0_4] : memref<6x1x256xf32, #tpu.memory_space<vmem>>, vector<1x1x256xf32>
    %4 = vector.shape_cast %3 : vector<1x1x256xf32> to vector<1x256xf32>
    %c1 = arith.constant 1 : index
    %c0_5 = arith.constant 0 : index
    %c0_6 = arith.constant 0 : index
    %5 = vector.load %arg6[%c1, %c0_5, %c0_6] : memref<6x1x256xf32, #tpu.memory_space<vmem>>, vector<1x1x256xf32>
    %6 = vector.shape_cast %5 : vector<1x1x256xf32> to vector<1x256xf32>
    %c2 = arith.constant 2 : index
    %c0_7 = arith.constant 0 : index
    %c0_8 = arith.constant 0 : index
    %7 = vector.load %arg6[%c2, %c0_7, %c0_8] : memref<6x1x256xf32, #tpu.memory_space<vmem>>, vector<1x1x256xf32>
    %8 = vector.shape_cast %7 : vector<1x1x256xf32> to vector<1x256xf32>
    %c3 = arith.constant 3 : index
    %c0_9 = arith.constant 0 : index
    %c0_10 = arith.constant 0 : index
    %9 = vector.load %arg6[%c3, %c0_9, %c0_10] : memref<6x1x256xf32, #tpu.memory_space<vmem>>, vector<1x1x256xf32>
    %10 = vector.shape_cast %9 : vector<1x1x256xf32> to vector<1x256xf32>
    %c4 = arith.constant 4 : index
    %c0_11 = arith.constant 0 : index
    %c0_12 = arith.constant 0 : index
    %11 = vector.load %arg6[%c4, %c0_11, %c0_12] : memref<6x1x256xf32, #tpu.memory_space<vmem>>, vector<1x1x256xf32>
    %12 = vector.shape_cast %11 : vector<1x1x256xf32> to vector<1x256xf32>
    %c5 = arith.constant 5 : index
    %c0_13 = arith.constant 0 : index
    %c0_14 = arith.constant 0 : index
    %13 = vector.load %arg6[%c5, %c0_13, %c0_14] : memref<6x1x256xf32, #tpu.memory_space<vmem>>, vector<1x1x256xf32>
    %14 = vector.shape_cast %13 : vector<1x1x256xf32> to vector<1x256xf32>
    %c0_i32 = arith.constant 0 : i32
    %15 = arith.index_cast %c0_i32 : i32 to index
    %c0_15 = arith.constant 0 : index
    %c0_16 = arith.constant 0 : index
    %16 = vector.load %arg1[%15, %c0_15, %c0_16] : memref<1x8x256xf32, #tpu.memory_space<vmem>>, vector<1x8x256xf32>
    %17 = vector.shape_cast %16 : vector<1x8x256xf32> to vector<8x256xf32>
    %c0_17 = arith.constant 0 : index
    %c128 = arith.constant 128 : index
    %18 = vector.load %arg8[%c0_17, %c128] : memref<8x512xf32, #tpu.memory_space<vmem>>, vector<8x256xf32>
    tpu.vector_store %arg8[%c0_17, %c128], %17 {strides = array<i32>} : memref<8x512xf32, #tpu.memory_space<vmem>>, vector<8x256xf32>,
    %c0_18 = arith.constant 0 : index
    %c111 = arith.constant 111 : index
    %19 = vector.load %arg8[%c0_18, %c111] : memref<8x512xf32, #tpu.memory_space<vmem>>, vector<8x256xf32>
    %20 = vector.broadcast %4 : vector<1x256xf32> to vector<8x256xf32>
    %21 = arith.mulf %19, %20 : vector<8x256xf32>
    %c0_19 = arith.constant 0 : index
    %c0_20 = arith.constant 0 : index
    %22 = vector.load %arg9[%c0_19, %c0_20] : memref<72x256xf32, #tpu.memory_space<vmem>>, vector<8x256xf32>
    tpu.vector_store %arg9[%c0_19, %c0_20], %21 {strides = array<i32>} : memref<72x256xf32, #tpu.memory_space<vmem>>, vector<8x256xf32>,
    %c0_21 = arith.constant 0 : index
    %c112 = arith.constant 112 : index
    %23 = vector.load %arg8[%c0_21, %c112] : memref<8x512xf32, #tpu.memory_space<vmem>>, vector<8x256xf32>
    %c8 = arith.constant 8 : index
    %c0_22 = arith.constant 0 : index
    %24 = vector.load %arg9[%c8, %c0_22] : memref<72x256xf32, #tpu.memory_space<vmem>>, vector<8x256xf32>
    tpu.vector_store %arg9[%c8, %c0_22], %23 {strides = array<i32>} : memref<72x256xf32, #tpu.memory_space<vmem>>, vector<8x256xf32>,
    %c0_23 = arith.constant 0 : index
    %c113 = arith.constant 113 : index
    %25 = vector.load %arg8[%c0_23, %c113] : memref<8x512xf32, #tpu.memory_space<vmem>>, vector<8x256xf32>
    %26 = vector.broadcast %6 : vector<1x256xf32> to vector<8x256xf32>
    %27 = arith.mulf %25, %26 : vector<8x256xf32>
    %c16 = arith.constant 16 : index
    %c0_24 = arith.constant 0 : index
    %28 = vector.load %arg9[%c16, %c0_24] : memref<72x256xf32, #tpu.memory_space<vmem>>, vector<8x256xf32>
    tpu.vector_store %arg9[%c16, %c0_24], %27 {strides = array<i32>} : memref<72x256xf32, #tpu.memory_space<vmem>>, vector<8x256xf32>,
    %c0_25 = arith.constant 0 : index
    %c127 = arith.constant 127 : index
    %29 = vector.load %arg8[%c0_25, %c127] : memref<8x512xf32, #tpu.memory_space<vmem>>, vector<8x256xf32>
    %30 = vector.broadcast %8 : vector<1x256xf32> to vector<8x256xf32>
    %31 = arith.mulf %29, %30 : vector<8x256xf32>
    %c24 = arith.constant 24 : index
    %c0_26 = arith.constant 0 : index
    %32 = vector.load %arg9[%c24, %c0_26] : memref<72x256xf32, #tpu.memory_space<vmem>>, vector<8x256xf32>
    tpu.vector_store %arg9[%c24, %c0_26], %31 {strides = array<i32>} : memref<72x256xf32, #tpu.memory_space<vmem>>, vector<8x256xf32>,
    %c0_27 = arith.constant 0 : index
    %c128_28 = arith.constant 128 : index
    %33 = vector.load %arg8[%c0_27, %c128_28] : memref<8x512xf32, #tpu.memory_space<vmem>>, vector<8x256xf32>
    %c32 = arith.constant 32 : index
    %c0_29 = arith.constant 0 : index
    %34 = vector.load %arg9[%c32, %c0_29] : memref<72x256xf32, #tpu.memory_space<vmem>>, vector<8x256xf32>
    tpu.vector_store %arg9[%c32, %c0_29], %33 {strides = array<i32>} : memref<72x256xf32, #tpu.memory_space<vmem>>, vector<8x256xf32>,
    %c0_30 = arith.constant 0 : index
    %c129 = arith.constant 129 : index
    %35 = vector.load %arg8[%c0_30, %c129] : memref<8x512xf32, #tpu.memory_space<vmem>>, vector<8x256xf32>
    %36 = vector.broadcast %10 : vector<1x256xf32> to vector<8x256xf32>
    %37 = arith.mulf %35, %36 : vector<8x256xf32>
    %c40 = arith.constant 40 : index
    %c0_31 = arith.constant 0 : index
    %38 = vector.load %arg9[%c40, %c0_31] : memref<72x256xf32, #tpu.memory_space<vmem>>, vector<8x256xf32>
    tpu.vector_store %arg9[%c40, %c0_31], %37 {strides = array<i32>} : memref<72x256xf32, #tpu.memory_space<vmem>>, vector<8x256xf32>,
    %c0_32 = arith.constant 0 : index
    %c143 = arith.constant 143 : index
    %39 = vector.load %arg8[%c0_32, %c143] : memref<8x512xf32, #tpu.memory_space<vmem>>, vector<8x256xf32>
    %40 = vector.broadcast %12 : vector<1x256xf32> to vector<8x256xf32>
    %41 = arith.mulf %39, %40 : vector<8x256xf32>
    %c48 = arith.constant 48 : index
    %c0_33 = arith.constant 0 : index
    %42 = vector.load %arg9[%c48, %c0_33] : memref<72x256xf32, #tpu.memory_space<vmem>>, vector<8x256xf32>
    tpu.vector_store %arg9[%c48, %c0_33], %41 {strides = array<i32>} : memref<72x256xf32, #tpu.memory_space<vmem>>, vector<8x256xf32>,
    %c0_34 = arith.constant 0 : index
    %c144 = arith.constant 144 : index
    %43 = vector.load %arg8[%c0_34, %c144] : memref<8x512xf32, #tpu.memory_space<vmem>>, vector<8x256xf32>
    %c56 = arith.constant 56 : index
    %c0_35 = arith.constant 0 : index
    %44 = vector.load %arg9[%c56, %c0_35] : memref<72x256xf32, #tpu.memory_space<vmem>>, vector<8x256xf32>
    tpu.vector_store %arg9[%c56, %c0_35], %43 {strides = array<i32>} : memref<72x256xf32, #tpu.memory_space<vmem>>, vector<8x256xf32>,
    %c0_36 = arith.constant 0 : index
    %c145 = arith.constant 145 : index
    %45 = vector.load %arg8[%c0_36, %c145] : memref<8x512xf32, #tpu.memory_space<vmem>>, vector<8x256xf32>
    %46 = vector.broadcast %14 : vector<1x256xf32> to vector<8x256xf32>
    %47 = arith.mulf %45, %46 : vector<8x256xf32>
    %c64 = arith.constant 64 : index
    %c0_37 = arith.constant 0 : index
    %48 = vector.load %arg9[%c64, %c0_37] : memref<72x256xf32, #tpu.memory_space<vmem>>, vector<8x256xf32>
    tpu.vector_store %arg9[%c64, %c0_37], %47 {strides = array<i32>} : memref<72x256xf32, #tpu.memory_space<vmem>>, vector<8x256xf32>,
    %c0_38 = arith.constant 0 : index
    %c0_39 = arith.constant 0 : index
    %49 = vector.load %arg2[%c0_38, %c0_39] : memref<8x72xf32, #tpu.memory_space<vmem>>, vector<8x72xf32>
    %c0_40 = arith.constant 0 : index
    %c0_41 = arith.constant 0 : index
    %50 = vector.load %arg9[%c0_40, %c0_41] : memref<72x256xf32, #tpu.memory_space<vmem>>, vector<72x256xf32>
    %cst_42 = arith.constant dense<0.000000e+00> : vector<8x256xf32>
    %51 = tpu.matmul %49, %50, %cst_42 {dimension_numbers = #tpu.dot_dimension_numbers<[1], [0], [0], [1], [0, 0, 1, 1], [], []>} : vector<8x72xf32>, vector<72x256xf32>, vector<8x256xf32> -> vector<8x256xf32>
    %c0_43 = arith.constant 0 : index
    %c0_44 = arith.constant 0 : index
    %52 = vector.load %arg3[%c0_43, %c0_44] : memref<8x1xf32, #tpu.memory_space<vmem>>, vector<8x1xf32>
    %53 = vector.broadcast %52 : vector<8x1xf32> to vector<8x256xf32>
    %54 = arith.addf %51, %53 : vector<8x256xf32>
    %cst_45 = arith.constant 0.000000e+00 : f32
    %55 = vector.broadcast %cst_45 : f32 to vector<8x256xf32>
    %56 = arith.maximumf %54, %55 : vector<8x256xf32>
    %c0_46 = arith.constant 0 : index
    %c128_47 = arith.constant 128 : index
    %57 = vector.load %arg8[%c0_46, %c128_47] : memref<8x512xf32, #tpu.memory_space<vmem>>, vector<8x256xf32>
    tpu.vector_store %arg8[%c0_46, %c128_47], %56 {strides = array<i32>} : memref<8x512xf32, #tpu.memory_space<vmem>>, vector<8x256xf32>,
    %c0_48 = arith.constant 0 : index
    %c111_49 = arith.constant 111 : index
    %58 = vector.load %arg8[%c0_48, %c111_49] : memref<8x512xf32, #tpu.memory_space<vmem>>, vector<8x256xf32>
    %59 = vector.broadcast %4 : vector<1x256xf32> to vector<8x256xf32>
    %60 = arith.mulf %58, %59 : vector<8x256xf32>
    %c0_50 = arith.constant 0 : index
    %c0_51 = arith.constant 0 : index
    %61 = vector.load %arg9[%c0_50, %c0_51] : memref<72x256xf32, #tpu.memory_space<vmem>>, vector<8x256xf32>
    tpu.vector_store %arg9[%c0_50, %c0_51], %60 {strides = array<i32>} : memref<72x256xf32, #tpu.memory_space<vmem>>, vector<8x256xf32>,
    %c0_52 = arith.constant 0 : index
    %c112_53 = arith.constant 112 : index
    %62 = vector.load %arg8[%c0_52, %c112_53] : memref<8x512xf32, #tpu.memory_space<vmem>>, vector<8x256xf32>
    %c8_54 = arith.constant 8 : index
    %c0_55 = arith.constant 0 : index
    %63 = vector.load %arg9[%c8_54, %c0_55] : memref<72x256xf32, #tpu.memory_space<vmem>>, vector<8x256xf32>
    tpu.vector_store %arg9[%c8_54, %c0_55], %62 {strides = array<i32>} : memref<72x256xf32, #tpu.memory_space<vmem>>, vector<8x256xf32>,
    %c0_56 = arith.constant 0 : index
    %c113_57 = arith.constant 113 : index
    %64 = vector.load %arg8[%c0_56, %c113_57] : memref<8x512xf32, #tpu.memory_space<vmem>>, vector<8x256xf32>
    %65 = vector.broadcast %6 : vector<1x256xf32> to vector<8x256xf32>
    %66 = arith.mulf %64, %65 : vector<8x256xf32>
    %c16_58 = arith.constant 16 : index
    %c0_59 = arith.constant 0 : index
    %67 = vector.load %arg9[%c16_58, %c0_59] : memref<72x256xf32, #tpu.memory_space<vmem>>, vector<8x256xf32>
    tpu.vector_store %arg9[%c16_58, %c0_59], %66 {strides = array<i32>} : memref<72x256xf32, #tpu.memory_space<vmem>>, vector<8x256xf32>,
    %c0_60 = arith.constant 0 : index
    %c127_61 = arith.constant 127 : index
    %68 = vector.load %arg8[%c0_60, %c127_61] : memref<8x512xf32, #tpu.memory_space<vmem>>, vector<8x256xf32>
    %69 = vector.broadcast %8 : vector<1x256xf32> to vector<8x256xf32>
    %70 = arith.mulf %68, %69 : vector<8x256xf32>
    %c24_62 = arith.constant 24 : index
    %c0_63 = arith.constant 0 : index
    %71 = vector.load %arg9[%c24_62, %c0_63] : memref<72x256xf32, #tpu.memory_space<vmem>>, vector<8x256xf32>
    tpu.vector_store %arg9[%c24_62, %c0_63], %70 {strides = array<i32>} : memref<72x256xf32, #tpu.memory_space<vmem>>, vector<8x256xf32>,
    %c0_64 = arith.constant 0 : index
    %c128_65 = arith.constant 128 : index
    %72 = vector.load %arg8[%c0_64, %c128_65] : memref<8x512xf32, #tpu.memory_space<vmem>>, vector<8x256xf32>
    %c32_66 = arith.constant 32 : index
    %c0_67 = arith.constant 0 : index
    %73 = vector.load %arg9[%c32_66, %c0_67] : memref<72x256xf32, #tpu.memory_space<vmem>>, vector<8x256xf32>
    tpu.vector_store %arg9[%c32_66, %c0_67], %72 {strides = array<i32>} : memref<72x256xf32, #tpu.memory_space<vmem>>, vector<8x256xf32>,
    %c0_68 = arith.constant 0 : index
    %c129_69 = arith.constant 129 : index
    %74 = vector.load %arg8[%c0_68, %c129_69] : memref<8x512xf32, #tpu.memory_space<vmem>>, vector<8x256xf32>
    %75 = vector.broadcast %10 : vector<1x256xf32> to vector<8x256xf32>
    %76 = arith.mulf %74, %75 : vector<8x256xf32>
    %c40_70 = arith.constant 40 : index
    %c0_71 = arith.constant 0 : index
    %77 = vector.load %arg9[%c40_70, %c0_71] : memref<72x256xf32, #tpu.memory_space<vmem>>, vector<8x256xf32>
    tpu.vector_store %arg9[%c40_70, %c0_71], %76 {strides = array<i32>} : memref<72x256xf32, #tpu.memory_space<vmem>>, vector<8x256xf32>,
    %c0_72 = arith.constant 0 : index
    %c143_73 = arith.constant 143 : index
    %78 = vector.load %arg8[%c0_72, %c143_73] : memref<8x512xf32, #tpu.memory_space<vmem>>, vector<8x256xf32>
    %79 = vector.broadcast %12 : vector<1x256xf32> to vector<8x256xf32>
    %80 = arith.mulf %78, %79 : vector<8x256xf32>
    %c48_74 = arith.constant 48 : index
    %c0_75 = arith.constant 0 : index
    %81 = vector.load %arg9[%c48_74, %c0_75] : memref<72x256xf32, #tpu.memory_space<vmem>>, vector<8x256xf32>
    tpu.vector_store %arg9[%c48_74, %c0_75], %80 {strides = array<i32>} : memref<72x256xf32, #tpu.memory_space<vmem>>, vector<8x256xf32>,
    %c0_76 = arith.constant 0 : index
    %c144_77 = arith.constant 144 : index
    %82 = vector.load %arg8[%c0_76, %c144_77] : memref<8x512xf32, #tpu.memory_space<vmem>>, vector<8x256xf32>
    %c56_78 = arith.constant 56 : index
    %c0_79 = arith.constant 0 : index
    %83 = vector.load %arg9[%c56_78, %c0_79] : memref<72x256xf32, #tpu.memory_space<vmem>>, vector<8x256xf32>
    tpu.vector_store %arg9[%c56_78, %c0_79], %82 {strides = array<i32>} : memref<72x256xf32, #tpu.memory_space<vmem>>, vector<8x256xf32>,
    %c0_80 = arith.constant 0 : index
    %c145_81 = arith.constant 145 : index
    %84 = vector.load %arg8[%c0_80, %c145_81] : memref<8x512xf32, #tpu.memory_space<vmem>>, vector<8x256xf32>
    %85 = vector.broadcast %14 : vector<1x256xf32> to vector<8x256xf32>
    %86 = arith.mulf %84, %85 : vector<8x256xf32>
    %c64_82 = arith.constant 64 : index
    %c0_83 = arith.constant 0 : index
    %87 = vector.load %arg9[%c64_82, %c0_83] : memref<72x256xf32, #tpu.memory_space<vmem>>, vector<8x256xf32>
    tpu.vector_store %arg9[%c64_82, %c0_83], %86 {strides = array<i32>} : memref<72x256xf32, #tpu.memory_space<vmem>>, vector<8x256xf32>,
    %c0_84 = arith.constant 0 : index
    %c0_85 = arith.constant 0 : index
    %88 = vector.load %arg4[%c0_84, %c0_85] : memref<8x72xf32, #tpu.memory_space<vmem>>, vector<8x72xf32>
    %c0_86 = arith.constant 0 : index
    %c0_87 = arith.constant 0 : index
    %89 = vector.load %arg9[%c0_86, %c0_87] : memref<72x256xf32, #tpu.memory_space<vmem>>, vector<72x256xf32>
    %cst_88 = arith.constant dense<0.000000e+00> : vector<8x256xf32>
    %90 = tpu.matmul %88, %89, %cst_88 {dimension_numbers = #tpu.dot_dimension_numbers<[1], [0], [0], [1], [0, 0, 1, 1], [], []>} : vector<8x72xf32>, vector<72x256xf32>, vector<8x256xf32> -> vector<8x256xf32>
    %c0_89 = arith.constant 0 : index
    %c0_90 = arith.constant 0 : index
    %91 = vector.load %arg5[%c0_89, %c0_90] : memref<8x1xf32, #tpu.memory_space<vmem>>, vector<8x1xf32>
    %92 = vector.broadcast %91 : vector<8x1xf32> to vector<8x256xf32>
    %93 = arith.addf %90, %92 : vector<8x256xf32>
    %94 = arith.index_cast %c0_i32 : i32 to index
    %c0_91 = arith.constant 0 : index
    %c0_92 = arith.constant 0 : index
    %95 = vector.load %arg1[%94, %c0_91, %c0_92] : memref<1x8x256xf32, #tpu.memory_space<vmem>>, vector<1x8x256xf32>
    %96 = vector.shape_cast %95 : vector<1x8x256xf32> to vector<8x256xf32>
    %97 = arith.addf %93, %96 : vector<8x256xf32>
    %cst_93 = arith.constant 0.000000e+00 : f32
    %98 = vector.broadcast %cst_93 : f32 to vector<8x256xf32>
    %99 = arith.maximumf %97, %98 : vector<8x256xf32>
    %100 = arith.index_cast %c0_i32 : i32 to index
    %c0_94 = arith.constant 0 : index
    %c0_95 = arith.constant 0 : index
    %101 = vector.load %arg7[%100, %c0_94, %c0_95] : memref<1x8x256xf32, #tpu.memory_space<vmem>>, vector<1x8x256xf32>
    %102 = vector.shape_cast %101 : vector<1x8x256xf32> to vector<8x256xf32>
    %103 = vector.shape_cast %99 : vector<8x256xf32> to vector<1x8x256xf32>
    tpu.vector_store %arg7[%100, %c0_94, %c0_95], %103 {strides = array<i32>} : memref<1x8x256xf32, #tpu.memory_space<vmem>>, vector<1x8x256xf32>,
    %c1_i32 = arith.constant 1 : i32
    return
  }
  func.func @transform_0(%arg0: i32) -> (i32, i32, i32) {
    %c0_i32 = arith.constant 0 : i32
    %c0_i32_0 = arith.constant 0 : i32
    %c0_i32_1 = arith.constant 0 : i32
    return %arg0, %c0_i32, %c0_i32_0 : i32, i32, i32
  }
  func.func @transform_1(%arg0: i32) -> (i32, i32) {
    %c0_i32 = arith.constant 0 : i32
    %c0_i32_0 = arith.constant 0 : i32
    %c0_i32_1 = arith.constant 0 : i32
    return %c0_i32, %c0_i32_0 : i32, i32
  }
  func.func @transform_2(%arg0: i32) -> (i32, i32) {
    %c0_i32 = arith.constant 0 : i32
    %c0_i32_0 = arith.constant 0 : i32
    %c0_i32_1 = arith.constant 0 : i32
    return %c0_i32, %c0_i32_0 : i32, i32
  }
  func.func @transform_3(%arg0: i32) -> (i32, i32) {
    %c0_i32 = arith.constant 0 : i32
    %c0_i32_0 = arith.constant 0 : i32
    %c0_i32_1 = arith.constant 0 : i32
    return %c0_i32, %c0_i32_0 : i32, i32
  }
  func.func @transform_4(%arg0: i32) -> (i32, i32) {
    %c0_i32 = arith.constant 0 : i32
    %c0_i32_0 = arith.constant 0 : i32
    %c0_i32_1 = arith.constant 0 : i32
    return %c0_i32, %c0_i32_0 : i32, i32
  }
  func.func @transform_5(%arg0: i32) -> (i32, i32, i32) {
    %c0_i32 = arith.constant 0 : i32
    %c0_i32_0 = arith.constant 0 : i32
    %c0_i32_1 = arith.constant 0 : i32
    %c0_i32_2 = arith.constant 0 : i32
    return %c0_i32, %c0_i32_0, %c0_i32_1 : i32, i32, i32
  }
  func.func @transform_6(%arg0: i32) -> (i32, i32, i32) {
    %c0_i32 = arith.constant 0 : i32
    %c0_i32_0 = arith.constant 0 : i32
    %c0_i32_1 = arith.constant 0 : i32
    return %arg0, %c0_i32, %c0_i32_0 : i32, i32, i32
  }
}

</mosaic_0001>

<bundles_post_ra>
// kernel: tpu_custom_call.1
= control target key start
LH: loop header
LB: loop body
LE: loop exit
PB: predicated region body
PF: predicated region fallthrough
CT: control target
= control target key end

     0   :  { %11 = vsyncpa [#allocation5], 0  ;;  %s1762_s0 = inlined_call_operand.hbm [shape: f32[2,8,256], index: 0, kind: input, shape index: {}]   ;;  %s1763_s1 = inlined_call_operand.vmem [shape: f32[8,72], index: 1, kind: input, shape index: {}]   ;;  %s1764_s2 = inlined_call_operand.vmem [shape: f32[8,1], index: 2, kind: input, shape index: {}]   ;;  %s1765_s3 = inlined_call_operand.vmem [shape: f32[8,72], index: 3, kind: input, shape index: {}]   ;;  %s1766_s4 = inlined_call_operand.vmem [shape: f32[8,1], index: 4, kind: input, shape index: {}]   ;;  %s1767_s5 = inlined_call_operand.vmem [shape: f32[6,1,256], index: 5, kind: input, shape index: {}]   ;;  %s1768_s6 = inlined_call_operand.hbm [shape: f32[2,8,256], index: 6, kind: output, shape index: {}]  }
   0x1   :  { %13 = vsyncpa [#allocation5 + $0x1], 0 }
   0x2   :  { %14 = vsyncpa [#allocation6], 0 }
   0x3   :  { %16 = vsyncpa [#allocation6 + $0x1], 0  ;;  %s1351_s21 = smov 0   ;;  %s1353_s22 = smov 0  }
   0x4   :  { %s1355_s23 = smov 0   ;;  %s1357_s24 = smov 0  }
   0x5 LB: > { %s1372_s25 = sadd.s32 4294967295, %s1302_s24   ;;  %s1023_s26 = sadd.s32 4294967294, %s1302_s24   ;;  %s1302_s24 = sphi %s1357_s24, %s1783_s24   ;;  %s1298_s23 = sphi %s1355_s23, %s1782_s23   ;;  %s1294_s22 = sphi %s1353_s22, %s1781_s22   ;;  %s1290_s21 = sphi %s1351_s21, %s1780_s21  }
   0x6   : > { %s1376_s27 = sadd.s32 1, %s1302_s24   ;;  %s29_s28 = sadd.s32 1, %s1298_s23 }
   0x7   : > { %s26_s29 = ssub.s32 %s1302_s24, %s1376_s27  ;;  %p36_p0 = scmp.ne.s32.totalorder %s1298_s23, %s1294_s22 }
   0x8   : > { %p27_p1 = scmp.eq.s32.totalorder %s26_s29, 0  ;;  %p37_p2 = scmp.eq.s32.totalorder %s1302_s24, 0 }
   0x9   : > { %p42_p3 = scmp.ne.s32.totalorder %s1294_s22, %s1290_s21  ;;  %p43_p4 = scmp.eq.s32.totalorder %s1372_s25, 0 }
   0xa   : > { %s1388_s30 = scalar_select %p27_p1, %s1298_s23, %s29_s28  }
   0xb   : > { %p1390_p5 = por %p37_p2, %p36_p0  ;;  %p1394_p6 = por %p43_p4, %p42_p3 }
   0xc   : > { %p171_p7 = scmp.eq.s32.totalorder %s1372_s25, 1  ;;  %p177_p8 = scmp.eq.s32.totalorder %s1023_s26, 1 }
   0xd   : > { %p1090_p10 = scmp.lt.s32.totalorder %s1302_s24, 2  ;;  %s212_s11 = sand.u32 1, %s1298_s23  }
   0xe   : > { %p1401_p11 = por %p171_p7, %p36_p0  ;;  %p1405_p12 = por %p177_p8, %p42_p3 }
   0xf   : > { %s1044_s12 = sshll.u32 %s1302_s24, 8  ;;  %s1026_s13 = sshll.u32 %s212_s11, 4 }
  0x10   : > { %s1772_s9 = scalar_select %p1401_p11, 1, 0 }
  0x11   : > { %s1773_s10 = scalar_select %p1405_p12, 1, 0 }
  0x12   : > { %s1414_s16 = scalar_lea.hbm %s1762_s0, %s1044_s12  ;;  %s216_s17 = scalar_lea.vmem [#allocation4], %s1026_s13 }
  0x13   : > { %s224_s18 = sshll.u32 %s216_s17, 4  ;;  %p1418_p13 = pnand %p1090_p10, %p1390_p5  ;;  %s1422_s18 = int_to_ptr.vmem [resolvable:$true] %s224_s18 }
  0x14   : > { %s213_s20 = scalar_lea.sflag [#allocation5], %s212_s11  ;;  %s1206_s26 = scalar_lea.hbm %s1414_s16, 256 }
  0x15   : > { %p1207_p2 = scmp.ne.s32.totalorder %s1414_s16, %s1206_s26  ;;  %p1208_p3 = pneg %p1418_p13 }
  0x16   : > { %s1211_s7 = scalar_lea.hbm %s1762_s0, 512  ;;  %p1212_p5 = scmp.lt.u32.totalorder %s1414_s16, %s1762_s0 }
  0x17   : > { %p1209_p4 = pnand %p1208_p3, %p1207_p2  ;;  %p1213_p8 = scmp.lt.u32.totalorder %s1211_s7, %s1206_s26 }
  0x18   : > { %p1215_p9 = scmp.lt.u32.totalorder %s1206_s26, %s1414_s16 }
  0x19   : > { %p1210_p7 = pneg %p1209_p4  ;;  %p1214_p10 = por %p1213_p8, %p1212_p5 }
  0x1b   : > { %p1216_p0 = por %p1215_p9, %p1214_p10 }
  0x1d   : > { %p1217_p1 = pnand %p1216_p0, %p1210_p7 }
  0x1f   : > { %1220 = shalt.err (!%p1217_p1)
}
  0x20   : > { %s1221_s11 = scalar_lea.vmem %s1422_s18, 256  ;;  %s1304_s14 = smov [#allocation4]  }
  0x21   : > { %p1222_p2 = scmp.ne.s32.totalorder %s1422_s18, %s1221_s11  ;;  %s1226_s15 = sshll.u32 %s1304_s14, 4  ;;  %s1227_s15 = int_to_ptr.vmem [resolvable:$false] %s1226_s15 }
  0x22   : > { %s1228_s17 = scalar_lea.vmem %s1227_s15, 512  ;;  %p1229_p11 = scmp.lt.s32.totalorder %s1422_s18, %s1227_s15 }
  0x23   : > { %p1224_p4 = pnand %p1222_p2, %p1208_p3  ;;  %p1230_p5 = scmp.lt.s32.totalorder %s1228_s17, %s1221_s11 }
  0x25   : > { %p1225_p12 = pneg %p1224_p4  ;;  %p1231_p8 = por %p1230_p5, %p1229_p11 }
  0x27   : > { %p1232_p9 = pnand %p1231_p8, %p1225_p12 }
  0x29   : > { %1235 = shalt.err (!%p1232_p9)
}
  0x2a   : > { %1085 = dma.hbm_to_vmem [thread:$0]  (!%p1418_p13), %s1414_s16, 256, %s1422_s18, %s213_s20  }
  0x2b   : > { %p1775_p0 = scmp.lt.s32.totalorder %s1302_s24, 3  ;;  %p1776_p1 = scmp.ge.s32.totalorder %s1302_s24, 1 }
  0x2d   : > { %p230_p3 = pnand %p1776_p1, %p1775_p0 }
  0x2e   : > { %s1456_s26 = sand.u32 (!%p230_p3), 1, %s1294_s22  }
  0x2f   : > { %233 = sbr.rel (%p230_p3) target bundleno = 926 (0x39e), region = 44  ;;  %s1030_s28 = sshll.u32 (!%p230_p3), %s1456_s26, 4 }
  0x30   : > { %s236_s29 = scalar_lea.sflag (!%p230_p3), [#allocation5], %s1456_s26  ;;  %s1462_s19 = scalar_lea.vmem (!%p230_p3), [#allocation4], %s1030_s28 }
  0x36   : > { %1281 = dma.done.wait (%p1394_p6), %s236_s29, 256  }
  0x37   : > { %1283 = vsyncadd (%p1394_p6), %s236_s29, 4294967040  ;;  %v289_v0 = vlaneseq  ;;  %v1305_v2 = vmov 0.0   ;;  %v1032_v5 = vld [vmem:[%s1767_s5 + $0x2] sm:$0x3]  ;;  %v270_v6 = vld [vmem:[%s1767_s5] sm:$0x3] }
  0x38   : > { %654 = vmatprep.mubr.f32.mxu0 %v1305_v2  ;;  %923 = vmatprep.mubr.f32.mxu1 %v1305_v2  ;;  %s1306_s8 = smov 113   ;;  %s1307_s12 = smov 111   ;;  %v1033_v11 = vld [vmem:[%s1767_s5 + $0x4] sm:$0x3]  ;;  %v1034_v14 = vld [vmem:[%s1767_s5 + $0x6] sm:$0x3] }
  0x39   : > { %v290_v1 = vshrl.u32 %v289_v0, 7  ;;  %s1308_s17 = smov 127   ;;  %v1035_v17 = vld [vmem:[%s1767_s5 + $0x8] sm:$0x3]  ;;  %s1309_s18 = smov 1   ;;  %v1499_v23 = vld [vmem:[%s1462_s19] sm:$0xff] }
  0x3a   : > { %v1036_v20 = vld [vmem:[%s1767_s5 + $0xa] sm:$0x3]  ;;  %s1310_s13 = smov 15   ;;  %v1311_v25 = vmov 0   ;;  %s1312_s11 = smov 17   ;;  %vm301_vm0 = vcmask 908288  }
  0x3b   : > { %v291_v3 = vsub.s32 0, %v290_v1  ;;  %v295_v4 = vsub.s32 1, %v290_v1  ;;  %v1502_v24 = vld [vmem:[%s1462_s19 + $0x8] sm:$0xff]  ;;  %1169 = vset.pattern.permute.xlu1 %v1311_v25  ;;  %1205 = vset.pattern.permute.xlu0 %v1311_v25  ;;  %s1313_s14 = smov 16   ;;  %vm360_vm1 = vcmask 924672   ;;  %vm400_vm2 = vcmask 1039360  }
  0x3c   : > { %v1134_v26 = vpack.i.bf16 %v1502_v24, %v1499_v23  ;;  %vm417_vm3 = vcmask 7168   ;;  %vm377_vm4 = vcmask 121856   ;;  %v1154_v58 = vpack.i.bf16 %v1305_v2, %v1502_v24  ;;  %s1314_s19 = smov 112   ;;  %p1777_p11 = scmp.ne.s32.totalorder %s1772_s9, 0 }
  0x3d   : > { %v351_v7 = vrot.slane %v1032_v5, %v291_v3  ;;  %v292_v8 = vrot.slane %v270_v6, %v291_v3  ;;  %v355_v9 = vrot.slane %v1032_v5, %v295_v4  ;;  %v296_v10 = vrot.slane %v270_v6, %v295_v4  ;;  %v580_v5 = vld [vmem:[%s1764_s2] sm:$0xff] }
  0x3e   : > { %v395_v12 = vrot.slane %v1033_v11, %v295_v4  ;;  %v391_v13 = vrot.slane %v1033_v11, %v291_v3  ;;  %v439_v15 = vrot.slane %v1034_v14, %v295_v4  ;;  %v435_v16 = vrot.slane %v1034_v14, %v291_v3 }
  0x3f   : > { %356 = vrot.lane.b32.xlu1 %v351_v7, %s1306_s8  ;;  %297 = vrot.lane.b32.xlu0 %v292_v8, %s1307_s12  ;;  %v477_v18 = vrot.slane %v1035_v17, %v295_v4  ;;  %v473_v19 = vrot.slane %v1035_v17, %v291_v3  ;;  %v534_v21 = vrot.slane %v1036_v20, %v295_v4  ;;  %vm318_vm5 = vcmask 138240  }
  0x40   : > { %v530_v22 = vrot.slane %v1036_v20, %v291_v3  ;;  %vm337_vm6 = vcmask 130048   ;;  %vm516_vm7 = vcmask 916480   ;;  %vm586_vm8 = vcmask 588800  }
  0x43   : > { %358 = vrot.lane.b32.xlu1 %v355_v9, %s1306_s8  ;;  %299 = vrot.lane.b32.xlu0 %v296_v10, %s1307_s12 }
  0x47   : > { %398 = vrot.lane.b32.xlu1 %v395_v12, %s1308_s17  ;;  %396 = vrot.lane.b32.xlu0 %v391_v13, %s1308_s17 }
  0x4b   : > { %442 = vrot.lane.b32.xlu1 %v439_v15, %s1309_s18  ;;  %440 = vrot.lane.b32.xlu0 %v435_v16, %s1309_s18 }
  0x4f   : > { %480 = vrot.lane.b32.xlu1 %v477_v18, %s1310_s13  ;;  %478 = vrot.lane.b32.xlu0 %v473_v19, %s1310_s13 }
  0x53   : > { %537 = vrot.lane.b32.xlu1 %v534_v21, %s1312_s11  ;;  %535 = vrot.lane.b32.xlu0 %v530_v22, %s1312_s11 }
  0x57   : > { %1135 = vrot.lane.b32.xlu1 %v1134_v26, %s1313_s14 }
  0x5b   : > { %331 = vrot.lane.b32.xlu1 %v1305_v2, %s1313_s14 }
  0xb1   : > { %v357_v27 = vpop.permute.xlu1 %356  ;;  %v298_v28 = vpop.permute.xlu0 %297 }
  0xb2   : > { %v1511_v29 = vmul.f32 0.0, %v298_v28  ;;  %v1513_v30 = vmul.f32 0.0, %v357_v27 }
  0xb4   : > { %312 = vrot.lane.b32.xlu0 %v1511_v29, %s1312_s11 }
  0xb5   : > { %v1517_v31 = vpop.permute.xlu1 %358  ;;  %v1519_v32 = vpop.permute.xlu0 %299 }
  0xb6   : > { %v1523_v33 = vsel %vm301_vm0, %v298_v28, %v1519_v32  ;;  %v308_v34 = vmul.f32 %v1519_v32, %v1502_v24  ;;  %v1529_v35 = vsel %vm360_vm1, %v357_v27, %v1517_v31  ;;  %v367_v37 = vmul.f32 %v1517_v31, %v1502_v24 }
  0xb7   : > { %v307_v36 = vmul.f32 %v1523_v33, %v1499_v23  ;;  %v366_v41 = vmul.f32 %v1529_v35, %v1499_v23 }
  0xb8   : > { %371 = vrot.lane.b32.xlu0 %v1513_v30, %s1310_s13 }
  0xb9   : > { %v1537_v38 = vpop.permute.xlu1 %398  ;;  %v397_v39 = vpop.permute.xlu0 %396  ;;  %v1139_v40 = vpack.i.bf16 %v308_v34, %v307_v36  ;;  %v1144_v49 = vpack.i.bf16 %v367_v37, %v366_v41 }
  0xba   : > { %v407_v42 = vmul.f32 %v1537_v38, %v1502_v24  ;;  %v1545_v43 = vsel %vm400_vm2, %v397_v39, %v1537_v38  ;;  %v405_v44 = vmul.f32 0.0, %v397_v39 }
  0xbb   : > { %v406_v45 = vmul.f32 %v1545_v43, %v1499_v23 }
  0xbc   : > { %1140 = vrot.lane.b32.xlu0 %v1139_v40, %s1312_s11  ;;  %411 = vrot.lane.b32.xlu1 %v405_v44, %s1309_s18 }
  0xbd   : > { %v443_v46 = vpop.permute.xlu1 %442  ;;  %v1551_v47 = vpop.permute.xlu0 %440  ;;  %v1149_v48 = vpack.i.bf16 %v407_v42, %v406_v45 }
  0xbe   : > { %v1555_v50 = vsel %vm417_vm3, %v1551_v47, %v443_v46  ;;  %v1561_v53 = vmul.f32 0.0, %v443_v46  ;;  %v448_v54 = vmul.f32 %v1551_v47, %v1499_v23 }
  0xbf   : > { %v449_v55 = vmul.f32 %v1555_v50, %v1502_v24 }
  0xc0   : > { %1145 = vrot.lane.b32.xlu0 %v1144_v49, %s1310_s13  ;;  %1150 = vrot.lane.b32.xlu1 %v1149_v48, %s1309_s18 }
  0xc1   : > { %v481_v51 = vpop.permute.xlu1 %480  ;;  %v1559_v52 = vpop.permute.xlu0 %478  ;;  %v1159_v61 = vpack.i.bf16 %v1561_v53, %v449_v55 }
  0xc2   : > { %v486_v56 = vmul.f32 %v1559_v52, %v1499_v23  ;;  %v1571_v57 = vsel %vm377_vm4, %v1559_v52, %v481_v51  ;;  %v1577_v59 = vmul.f32 0.0, %v481_v51 }
  0xc3   : > { %v487_v60 = vmul.f32 %v1571_v57, %v1502_v24 }
  0xc4   : > { %454 = vrot.lane.b32.xlu1 %v448_v54, %s1308_s17  ;;  %492 = vrot.lane.b32.xlu0 %v486_v56, %s1306_s8 }
  0xc5   : > { %v538_v62 = vpop.permute.xlu1 %537  ;;  %v1582_v63 = vpop.permute.xlu0 %535  ;;  %v1164_v1 = vpack.i.bf16 %v1577_v59, %v487_v60 }
  0xc6   : > { %v1588_v0 = vsel %vm318_vm5, %v1582_v63, %v538_v62  ;;  %v1591_v3 = vmul.f32 0.0, %v538_v62  ;;  %v543_v6 = vmul.f32 %v1582_v63, %v1499_v23 }
  0xc7   : > { %v544_v4 = vmul.f32 %v1588_v0, %v1502_v24 }
  0xc8   : > { %1155 = vrot.lane.b32.xlu1 %v1154_v58, %s1314_s19  ;;  %1160 = vrot.lane.b32.xlu0 %v1159_v61, %s1308_s17 }
  0xc9   : > { %v1136_v7 = vpop.permute.xlu1 %1135 }
  0xca   : > { %v1138_v11 = vunpack.i.h.bf16 %v1136_v7  ;;  %v1137_v12 = vunpack.i.l.bf16 %v1136_v7 }
  0xcc   : > { %510 = vrot.lane.b32.xlu1 %v1499_v23, %s1314_s19  ;;  %1165 = vrot.lane.b32.xlu0 %v1164_v1, %s1306_s8  ;;  %v339_v19 = vsel %vm337_vm6, %v1137_v12, %v1138_v11 }
  0xcd   : > { %v332_v9 = vpop.permute.xlu1 %331 }
  0xce   : > { %v338_v17 = vsel %vm337_vm6, %v332_v9, %v1137_v12 }
  0xd0   : > { %553 = vrot.lane.b32.xlu1 %v1591_v3, %s1307_s12  ;;  %551 = vrot.lane.b32.xlu0 %v544_v4, %s1307_s12 }
  0xd4   : > { %583 = vperm.xlu1 %1169, %v580_v5   ;;  %549 = vrot.lane.b32.xlu0 %v543_v6, %s1307_s12 }
  0xd8   : > { %692 = vrot.lane.b32.xlu1 %v1305_v2, %s1313_s14  ;;  %674 = vrot.lane.b32.xlu0 %v1511_v29, %s1312_s11 }
  0xdc   : > { %734 = vrot.lane.b32.xlu1 %v405_v44, %s1309_s18  ;;  %713 = vrot.lane.b32.xlu0 %v1513_v30, %s1310_s13 }
 0x126   : > { %v313_v8 = vpop.permute.xlu0 %312 }
 0x12a   : > { %v372_v10 = vpop.permute.xlu0 %371 }
 0x12e   : > { %v412_v13 = vpop.permute.xlu1 %411  ;;  %v1141_v14 = vpop.permute.xlu0 %1140 }
 0x12f   : > { %v1143_v15 = vunpack.i.h.bf16 %v1141_v14  ;;  %v1142_v16 = vunpack.i.l.bf16 %v1141_v14 }
 0x131   : > { %v320_v18 = vsel %vm318_vm5, %v1142_v16, %v1143_v15  ;;  %v319_v20 = vsel %vm318_vm5, %v313_v8, %v1142_v16  ;;  %v561_v16 = vld [vmem:[%s1763_s1] sm:$0xff] }
 0x132   : > { %v1151_v21 = vpop.permute.xlu1 %1150  ;;  %v1146_v22 = vpop.permute.xlu0 %1145  ;;  %v1046_v25 = vpack.c.bf16 %v339_v19, %v320_v18  ;;  %v1048_v26 = vpack.c.bf16 %v338_v17, %v319_v20 }
 0x133   : > { %v1153_v27 = vunpack.i.h.bf16 %v1151_v21  ;;  %v1152_v28 = vunpack.i.l.bf16 %v1151_v21  ;;  %v1148_v29 = vunpack.i.h.bf16 %v1146_v22  ;;  %v1147_v30 = vunpack.i.l.bf16 %v1146_v22 }
 0x134   : > { %1047 = vmatprep.subr.bf16.mxu0 %v1046_v25 }
 0x135   : > { %1049 = vmatpush1.bf16.msra.mxu0 %v1048_v26  ;;  %v379_v34 = vsel %vm377_vm4, %v1147_v30, %v1148_v29  ;;  %v419_v36 = vsel %vm417_vm3, %v1152_v28, %v1153_v27  ;;  %v378_v37 = vsel %vm377_vm4, %v372_v10, %v1147_v30  ;;  %v418_v39 = vsel %vm417_vm3, %v412_v13, %v1152_v28 }
 0x136   : > { %v455_v40 = vpop.permute.xlu1 %454  ;;  %v493_v41 = vpop.permute.xlu0 %492  ;;  %v1050_v42 = vpack.c.bf16 %v419_v36, %v379_v34  ;;  %v1052_v44 = vpack.c.bf16 %v418_v39, %v378_v37 }
 0x138   : > { %1051 = vmatprep.subr.bf16.mxu0 %v1050_v42 }
 0x139   : > { %1053 = vmatpush1.bf16.msra.mxu0 %v1052_v44 }
 0x13a   : > { %v1156_v45 = vpop.permute.xlu1 %1155  ;;  %v1161_v46 = vpop.permute.xlu0 %1160 }
 0x13b   : > { %v1158_v48 = vunpack.i.h.bf16 %v1156_v45  ;;  %v1157_v49 = vunpack.i.l.bf16 %v1156_v45  ;;  %v1163_v51 = vunpack.i.h.bf16 %v1161_v46  ;;  %v1162_v54 = vunpack.i.l.bf16 %v1161_v46 }
 0x13d   : > { %v461_v55 = vsel %vm400_vm2, %v1162_v54, %v1163_v51  ;;  %v460_v56 = vsel %vm400_vm2, %v455_v40, %v1162_v54  ;;  %v518_v6 = vsel %vm516_vm7, %v1157_v49, %v1158_v48 }
 0x13e   : > { %v511_v58 = vpop.permute.xlu1 %510  ;;  %v1166_v60 = vpop.permute.xlu0 %1165  ;;  %v1054_v61 = vpack.c.bf16 %v461_v55, %v1502_v24  ;;  %v1056_v62 = vpack.c.bf16 %v460_v56, %v1499_v23 }
 0x13f   : > { %v517_v1 = vsel %vm516_vm7, %v511_v58, %v1157_v49  ;;  %v1168_v4 = vunpack.i.h.bf16 %v1166_v60  ;;  %v1167_v5 = vunpack.i.l.bf16 %v1166_v60 }
 0x140   : > { %1055 = vmatprep.subr.bf16.mxu0 %v1054_v61 }
 0x141   : > { %1057 = vmatpush1.bf16.msra.mxu0 %v1056_v62  ;;  %v499_v7 = vsel %vm360_vm1, %v1167_v5, %v1168_v4  ;;  %v498_v8 = vsel %vm360_vm1, %v493_v41, %v1167_v5 }
 0x142   : > { %v554_v9 = vpop.permute.xlu1 %553  ;;  %v552_v10 = vpop.permute.xlu0 %551  ;;  %v1058_v11 = vpack.c.bf16 %v518_v6, %v499_v7  ;;  %v1060_v12 = vpack.c.bf16 %v517_v1, %v498_v8 }
 0x143   : > { %v556_v13 = vsel %vm301_vm0, %v552_v10, %v554_v9 }
 0x144   : > { %1059 = vmatprep.subr.bf16.mxu0 %v1058_v11 }
 0x145   : > { %1061 = vmatpush1.bf16.msra.mxu0 %v1060_v12 }
 0x146   : > { %v550_v14 = vpop.permute.xlu0 %549  ;;  %606 = vmatprep.subr.mxu0 %v556_v13 }
 0x147   : > { %v555_v15 = vsel %vm301_vm0, %v550_v14, %v552_v10 }
 0x149   : > { %607 = vmatpush1.msra.mxu0 %v555_v15 }
 0x14a   : > { %1037 = vmatmul.mubr.msk.f32.vlgmr.msra.gmra.mrb[0].mxu0 %vm586_vm8, %v561_v16 }
 0x153   : > { %v584_v17 = vpop.permute.xlu1 %583 }
 0x21d   : > { %v656_v18 = vpop.f32.mrb[0].mxu0 }
 0x21e   : > { %v657_v19 = vadd.f32 %v656_v18, %v584_v17  ;;  %v658_v20 = vpop.f32.mrb[1].mxu0 }
 0x21f   : > { %v659_v21 = vadd.f32 %v658_v20, %v584_v17 }
 0x220   : > { %v1636_v22 = vmax.f32 %v657_v19, 0.0 }
 0x221   : > { %v1638_v25 = vmax.f32 %v659_v21, 0.0 }
 0x222   : > { %v669_v26 = vmul.f32 %v1636_v22, %v1523_v33  ;;  %v729_v29 = vmul.f32 %v1636_v22, %v1545_v43  ;;  %v708_v36 = vmul.f32 %v1636_v22, %v1529_v35  ;;  %v774_v43 = vmul.f32 %v1636_v22, %v1559_v52 }
 0x223   : > { %v1170_v27 = vpack.i.bf16 %v1638_v25, %v1636_v22  ;;  %v670_v28 = vmul.f32 %v1638_v25, %v1519_v32  ;;  %v730_v30 = vmul.f32 %v1638_v25, %v1537_v38  ;;  %v709_v33 = vmul.f32 %v1638_v25, %v1517_v31 }
 0x224   : > { %v753_v38 = vmul.f32 %v1636_v22, %v1551_v47  ;;  %v754_v35 = vmul.f32 %v1638_v25, %v1555_v50  ;;  %v1190_v31 = vpack.i.bf16 %v1305_v2, %v1638_v25  ;;  %v775_v47 = vmul.f32 %v1638_v25, %v1571_v57  ;;  %v850_v50 = vld [vmem:[%s1766_s4] sm:$0xff]  ;;  %v693_v57 = vpop.permute.xlu1 %692 }
 0x225   : > { %1171 = vrot.lane.b32.xlu1 %v1170_v27, %s1313_s14  ;;  %v1175_v34 = vpack.i.bf16 %v670_v28, %v669_v26  ;;  %v1185_v37 = vpack.i.bf16 %v730_v30, %v729_v29  ;;  %v1180_v32 = vpack.i.bf16 %v709_v33, %v708_v36  ;;  %v814_v2 = vmul.f32 %v1638_v25, %v1588_v0 }
 0x226   : > { %v1195_v39 = vpack.i.bf16 %v1561_v53, %v754_v35  ;;  %v1200_v52 = vpack.i.bf16 %v1577_v59, %v775_v47  ;;  %v813_v53 = vmul.f32 %v1636_v22, %v1582_v63  ;;  %v675_v59 = vpop.permute.xlu0 %674 }
 0x227   : > { %1176 = vrot.lane.b32.xlu0 %v1175_v34, %s1312_s11 }
 0x228   : > { %v735_v40 = vpop.permute.xlu1 %734 }
 0x229   : > { %1186 = vrot.lane.b32.xlu1 %v1185_v37, %s1309_s18 }
 0x22a   : > { %v714_v41 = vpop.permute.xlu0 %713 }
 0x22b   : > { %1181 = vrot.lane.b32.xlu0 %v1180_v32, %s1310_s13  ;;  %s267_s13 = scalar_lea.vmem [#allocation7], %s1030_s28  ;;  %s1315_s28 = smov [#allocation7]  }
 0x22c   : > { %s953_s11 = sshll.u32 %s267_s13, 4  ;;  %s1240_s16 = sshll.u32 %s1315_s28, 4  ;;  %s1720_s11 = int_to_ptr.vmem [resolvable:$true] %s953_s11  ;;  %s1241_s16 = int_to_ptr.vmem [resolvable:$false] %s1240_s16 }
 0x22d   : > { %759 = vrot.lane.b32.xlu1 %v753_v38, %s1308_s17  ;;  %s1236_s29 = scalar_lea.vmem %s1720_s11, 256  ;;  %s1242_s20 = scalar_lea.vmem %s1241_s16, 512 }
 0x22e   : > { %p1237_p6 = scmp.ne.s32.totalorder %s1720_s11, %s1236_s29  ;;  %p1243_p7 = scmp.lt.s32.totalorder %s1720_s11, %s1241_s16 }
 0x22f   : > { %780 = vrot.lane.b32.xlu0 %v774_v43, %s1306_s8  ;;  %p1244_p10 = scmp.lt.s32.totalorder %s1242_s20, %s1236_s29 }
 0x230   : > { %p1238_p12 = pnand %p1237_p6, %p1777_p11 }
 0x231   : > { %1191 = vrot.lane.b32.xlu1 %v1190_v31, %s1314_s19  ;;  %v831_v31 = vld [vmem:[%s1765_s3] sm:$0xff]  ;;  %p1245_p2 = por %p1244_p10, %p1243_p7 }
 0x232   : > { %p1239_p13 = pneg %p1238_p12 }
 0x233   : > { %1196 = vrot.lane.b32.xlu0 %v1195_v39, %s1308_s17  ;;  %s1045_s17 = sshll.u32 %s1372_s25, 8  ;;  %s939_s25 = scalar_lea.sflag [#allocation6], %s1456_s26 }
 0x234   : > { %s1718_s15 = scalar_lea.hbm %s1768_s6, %s1045_s17  ;;  %p1246_p4 = pnand %p1245_p2, %p1239_p13 }
 0x235   : > { %798 = vrot.lane.b32.xlu1 %v1636_v22, %s1314_s19 }
 0x237   : > { %1201 = vrot.lane.b32.xlu0 %v1200_v52, %s1306_s8 }
 0x239   : > { %823 = vrot.lane.b32.xlu1 %v1591_v3, %s1307_s12 }
 0x23b   : > { %821 = vrot.lane.b32.xlu0 %v814_v2, %s1307_s12 }
 0x23d   : > { %853 = vperm.xlu1 %1169, %v850_v50  }
 0x23f   : > { %819 = vrot.lane.b32.xlu0 %v813_v53, %s1307_s12 }
 0x297   : > { %v1172_v3 = vpop.permute.xlu1 %1171 }
 0x298   : > { %v1174_v42 = vunpack.i.h.bf16 %v1172_v3  ;;  %v1173_v44 = vunpack.i.l.bf16 %v1172_v3 }
 0x299   : > { %v1177_v0 = vpop.permute.xlu0 %1176 }
 0x29a   : > { %v1179_v45 = vunpack.i.h.bf16 %v1177_v0  ;;  %v1178_v46 = vunpack.i.l.bf16 %v1177_v0  ;;  %v699_v49 = vsel %vm337_vm6, %v1173_v44, %v1174_v42  ;;  %v698_v51 = vsel %vm337_vm6, %v693_v57, %v1173_v44 }
 0x29b   : > { %v1187_v48 = vpop.permute.xlu1 %1186 }
 0x29c   : > { %v1189_v54 = vunpack.i.h.bf16 %v1187_v48  ;;  %v1188_v55 = vunpack.i.l.bf16 %v1187_v48  ;;  %v681_v63 = vsel %vm318_vm5, %v1178_v46, %v1179_v45  ;;  %v680_v56 = vsel %vm318_vm5, %v675_v59, %v1178_v46 }
 0x29d   : > { %v1182_v58 = vpop.permute.xlu0 %1181  ;;  %v1062_v60 = vpack.c.bf16 %v699_v49, %v681_v63  ;;  %v1064_v61 = vpack.c.bf16 %v698_v51, %v680_v56 }
 0x29e   : > { %v1184_v62 = vunpack.i.h.bf16 %v1182_v58  ;;  %v1183_v1 = vunpack.i.l.bf16 %v1182_v58  ;;  %v741_v6 = vsel %vm417_vm3, %v1188_v55, %v1189_v54  ;;  %v740_v8 = vsel %vm417_vm3, %v735_v40, %v1188_v55 }
 0x29f   : > { %v760_v4 = vpop.permute.xlu1 %759  ;;  %1063 = vmatprep.subr.bf16.mxu1 %v1062_v60 }
 0x2a0   : > { %1065 = vmatpush1.bf16.msra.mxu1 %v1064_v61  ;;  %v720_v5 = vsel %vm377_vm4, %v1183_v1, %v1184_v62  ;;  %v719_v7 = vsel %vm377_vm4, %v714_v41, %v1183_v1 }
 0x2a1   : > { %v781_v9 = vpop.permute.xlu0 %780  ;;  %v1066_v10 = vpack.c.bf16 %v741_v6, %v720_v5  ;;  %v1068_v11 = vpack.c.bf16 %v740_v8, %v719_v7 }
 0x2a3   : > { %v1192_v12 = vpop.permute.xlu1 %1191  ;;  %1067 = vmatprep.subr.bf16.mxu1 %v1066_v10 }
 0x2a4   : > { %1069 = vmatpush1.bf16.msra.mxu1 %v1068_v11  ;;  %v1194_v16 = vunpack.i.h.bf16 %v1192_v12  ;;  %v1193_v17 = vunpack.i.l.bf16 %v1192_v12 }
 0x2a5   : > { %v1197_v13 = vpop.permute.xlu0 %1196 }
 0x2a6   : > { %v1199_v14 = vunpack.i.h.bf16 %v1197_v13  ;;  %v1198_v15 = vunpack.i.l.bf16 %v1197_v13  ;;  %v805_v36 = vsel %vm516_vm7, %v1193_v17, %v1194_v16 }
 0x2a7   : > { %v799_v20 = vpop.permute.xlu1 %798 }
 0x2a8   : > { %v766_v18 = vsel %vm400_vm2, %v1198_v15, %v1199_v14  ;;  %v765_v19 = vsel %vm400_vm2, %v760_v4, %v1198_v15  ;;  %v804_v30 = vsel %vm516_vm7, %v799_v20, %v1193_v17 }
 0x2a9   : > { %v1202_v21 = vpop.permute.xlu0 %1201  ;;  %v1070_v26 = vpack.c.bf16 %v766_v18, %v1638_v25  ;;  %v1072_v27 = vpack.c.bf16 %v765_v19, %v1636_v22 }
 0x2aa   : > { %v1204_v28 = vunpack.i.h.bf16 %v1202_v21  ;;  %v1203_v29 = vunpack.i.l.bf16 %v1202_v21 }
 0x2ab   : > { %1071 = vmatprep.subr.bf16.mxu1 %v1070_v26  ;;  %v824_v43 = vpop.permute.xlu1 %823 }
 0x2ac   : > { %1073 = vmatpush1.bf16.msra.mxu1 %v1072_v27  ;;  %v787_v34 = vsel %vm360_vm1, %v1203_v29, %v1204_v28  ;;  %v786_v33 = vsel %vm360_vm1, %v781_v9, %v1203_v29 }
 0x2ad   : > { %v822_v37 = vpop.permute.xlu0 %821  ;;  %v1074_v32 = vpack.c.bf16 %v805_v36, %v787_v34  ;;  %v1076_v38 = vpack.c.bf16 %v804_v30, %v786_v33 }
 0x2ae   : > { %v826_v22 = vsel %vm301_vm0, %v822_v37, %v824_v43 }
 0x2af   : > { %1075 = vmatprep.subr.bf16.mxu1 %v1074_v32 }
 0x2b0   : > { %1077 = vmatpush1.bf16.msra.mxu1 %v1076_v38 }
 0x2b1   : > { %v820_v25 = vpop.permute.xlu0 %819  ;;  %875 = vmatprep.subr.mxu1 %v826_v22 }
 0x2b2   : > { %v825_v35 = vsel %vm301_vm0, %v820_v25, %v822_v37 }
 0x2b4   : > { %876 = vmatpush1.msra.mxu1 %v825_v35 }
 0x2b5   : > { %1038 = vmatmul.mubr.msk.f32.vlgmr.msra.gmra.mrb[0].mxu1 %vm586_vm8, %v831_v31 }
 0x2bc   : > { %v854_v39 = vpop.permute.xlu1 %853 }
 0x388   : > { %v925_v47 = vpop.f32.mrb[0].mxu1 }
 0x389   : > { %v926_v52 = vadd.f32 %v925_v47, %v854_v39  ;;  %v927_v2 = vpop.f32.mrb[1].mxu1 }
 0x38a   : > { %v928_v50 = vadd.f32 %v927_v2, %v854_v39 }
 0x38b   : > { %v932_v53 = vadd.f32 %v926_v52, %v1499_v23 }
 0x38c   : > { %v933_v57 = vadd.f32 %v928_v50, %v1502_v24 }
 0x38d   : > { %v934_v59 = vmax.f32 %v932_v53, 0.0 }
 0x38e   : > { %v935_v40 = vmax.f32 %v933_v57, 0.0 }
 0x38f   : > { %936 = vst [vmem:[%s267_s13] sm:$0xff] %v934_v59 }
 0x390   : > { %937 = vst [vmem:[%s267_s13 + $0x8] sm:$0xff] %v935_v40 }
 0x391   : > { %1249 = shalt.err (!%p1246_p4)
}
 0x392   : > { %s1250_s26 = scalar_lea.hbm %s1718_s15, 256  ;;  %s1254_s8 = scalar_lea.hbm %s1768_s6, 512 }
 0x393   : > { %p1251_p5 = scmp.ne.s32.totalorder %s1718_s15, %s1250_s26  ;;  %p1255_p0 = scmp.lt.u32.totalorder %s1718_s15, %s1768_s6 }
 0x394   : > { %p1256_p1 = scmp.lt.u32.totalorder %s1254_s8, %s1250_s26  ;;  %p1258_p6 = scmp.lt.u32.totalorder %s1250_s26, %s1718_s15 }
 0x395   : > { %p1252_p8 = pnand %p1251_p5, %p1777_p11 }
 0x396   : > { %p1257_p3 = por %p1256_p1, %p1255_p0 }
 0x397   : > { %p1253_p9 = pneg %p1252_p8 }
 0x398   : > { %p1259_p12 = por %p1258_p6, %p1257_p3 }
 0x39a   : > { %p1260_p13 = pnand %p1259_p12, %p1253_p9 }
 0x39c   : > { %1263 = shalt.err (!%p1260_p13)
}
 0x39d   : > { %1080 = dma.vmem_to_hbm [thread:$0]  (%p1777_p11), %s1720_s11, 256, %s1718_s15, %s939_s25  }
 0x39e PF: > { %s965_s13 = sand.u32 1, %s1290_s21   ;;  %p1778_p7 = scmp.ne.s32.totalorder %s1773_s10, 0 }
 0x39f   : > { %p1779_p10 = scmp.ge.s32.totalorder %s1302_s24, 2  ;;  %s966_s14 = scalar_lea.sflag [#allocation6], %s965_s13 }
 0x3a1   : > { %p1087_p2 = pnand %p1779_p10, %p1778_p7 }
 0x3a3   : > { %1285 = dma.done.wait (!%p1087_p2), %s966_s14, 256  }
 0x3a4   : > { %1287 = vsyncadd (!%p1087_p2), %s966_s14, 4294967040  ;;  %p19_p4 = scmp.ge.s32.totalorder %s1376_s27, 4   ;;  %s1780_s21 = smov %s1294_s22 }
 0x3a5   : > { %s1781_s22 = smov %s1298_s23  ;;  %s1782_s23 = smov %s1388_s30 }
 0x3a6   : > { %s1783_s24 = smov %s1376_s27  ;;  %21 = sbr.rel (!%p19_p4) target bundleno = 5 (0x5), region = 94 }
 0x3ad   :  { %971 = vsyncpa [#allocation5], 1 }
 0x3ae   :  { %973 = vsyncpa [#allocation5 + $0x1], 1 }
 0x3af   :  { %974 = vsyncpa [#allocation6], 1 }
 0x3b0   :  { %976 = vsyncpa [#allocation6 + $0x1], 1 }

</bundles_post_ra>
